<compile_context>
chip_gen: v7x
topology: tpu7x:2x2x1
jax: 0.10.0
libtpu: 0.0.40
codegen_flags: <defaults>
</compile_context>

<pallas_src>
import functools
import numpy as np
import jax
import jax.numpy as jnp
from jax.experimental import pallas as pl
from jax.experimental.pallas import tpu as pltpu


# ---------------------------------------------------------------------------
# Host-side (numpy) construction of the adaptive-pooling operators (static).
# ---------------------------------------------------------------------------
def _adaptive_bins(in_size, out_size):
    """PyTorch adaptive pooling bins: [floor(i*in/out), ceil((i+1)*in/out))."""
    starts = [(i * in_size) // out_size for i in range(out_size)]
    ends = [((i + 1) * in_size + out_size - 1) // out_size for i in range(out_size)]
    return starts, ends


def _avg_pool_matrix(in_size, out_size):
    """(out_size, in_size) matrix M with M @ v == adaptive_avg_pool1d(v)."""
    starts, ends = _adaptive_bins(in_size, out_size)
    M = np.zeros((out_size, in_size), np.float32)
    for i in range(out_size):
        M[i, starts[i]:ends[i]] = 1.0 / (ends[i] - starts[i])
    return M


def _max_select_matrices(in_size, out_size):
    """(kmax, out_size, in_size) one-hot selectors; max_k (S[k] @ v) == adaptive_max_pool1d(v)."""
    starts, ends = _adaptive_bins(in_size, out_size)
    kmax = max(ends[i] - starts[i] for i in range(out_size))
    S = np.zeros((kmax, out_size, in_size), np.float32)
    for i in range(out_size):
        for k in range(kmax):
            idx = min(starts[i] + k, ends[i] - 1)   # repeats don't change the max
            S[k, i, idx] = 1.0
    return S


def _pick_nc_blk(NC, H, cs, nc_blk_max):
    """Largest channel block that keeps every blocked sublane dim a multiple of 8."""
    for d in range(min(NC, max(1, nc_blk_max)), 0, -1):
        if NC % d == 0 and (d * H) % 8 == 0 and (d * cs) % 8 == 0:
            return d
    return NC   # whole array in one block: block dims == array dims is always legal


# ---------------------------------------------------------------------------
# Pallas kernel.
#   grid = (channel_blocks, cutn);  cut axis is the inner, sequential one.
#   At cut == 0 the pooled cutout for this channel block is computed into VMEM scratch;
#   every cut step then writes pooled + fac[cut] * noise[cut, block].
# ---------------------------------------------------------------------------
def _pool_noise_kernel(x_ref, awt_ref, ah_ref, sw_ref, ph_ref, noise_ref, facs_ref,
                       o_ref, pooled_ref, *, nc_blk, h):
    cut = pl.program_id(1)
    f32 = jnp.float32

    @pl.when(cut == 0)
    def _compute_pool():
        cs = ah_ref.shape[0]
        xf = x_ref[...]                                                   # (nc_blk*h, W)

        # ---- stage 1: contract W (lane dim) with one big-M matmul per operator ----
        avg_c = jnp.dot(xf, awt_ref[...], preferred_element_type=f32)     # (nc_blk*h, cs)
        max_c = jnp.dot(xf, sw_ref[0], preferred_element_type=f32)
        for k in range(1, sw_ref.shape[0]):
            max_c = jnp.maximum(max_c,
                                jnp.dot(xf, sw_ref[k], preferred_element_type=f32))

        # ---- stage 2: contract H per channel (small: only cs columns left) ----
        ah = ah_ref[...]                                                  # (cs, h)
        ph = [ph_ref[k] for k in range(ph_ref.shape[0])]                  # each (cs, h)
        for c in range(nc_blk):
            av = avg_c[c * h:(c + 1) * h, :]                              # (h, cs)
            mx = max_c[c * h:(c + 1) * h, :]
            a = jnp.dot(ah, av, preferred_element_type=f32)               # (cs, cs)
            m = jnp.dot(ph[0], mx, preferred_element_type=f32)
            for k in range(1, len(ph)):
                m = jnp.maximum(m, jnp.dot(ph[k], mx, preferred_element_type=f32))
            pooled_ref[c * cs:(c + 1) * cs, :] = (a + m) * 0.5

    # per-cut output: pooled cutout + per-cut noise factor * gaussian noise
    o_ref[0] = pooled_ref[...] + facs_ref[cut] * noise_ref[0]


# ---------------------------------------------------------------------------
# MakeCutoutsCumin.forward
# ---------------------------------------------------------------------------
def make_cutouts_cumin(x, key, cut_size, cutn, cut_pow=1.0, noise_fac=0.1,
                       matmul_dtype=jnp.float32, nc_blk_max=8):
    """x: (N, C, H, W) float32.  Returns (cutn*N, C, cut_size, cut_size) float32."""
    # cut_pow is kept for interface parity; MakeCutoutsCumin.forward never uses it.
    del cut_pow
    N, C, H, W = x.shape
    NC = N * C
    cs = int(cut_size)

    # Static pooling operators (exact, built on the host with numpy).
    ah = _avg_pool_matrix(H, cs)                                    # (cs, H)
    awt = _avg_pool_matrix(W, cs).T                                 # (W, cs)
    ph = _max_select_matrices(H, cs)                                # (kmax_h, cs, H)
    sw = np.transpose(_max_select_matrices(W, cs), (0, 2, 1))       # (kmax_w, W, cs)

    # Channel block size: as large as practical (fold N*C into the block, not the grid).
    # NOTE (v7x): size this against 64 MiB VMEM for very large H*W; double-buffered img
    # block costs ~2 * nc_blk * H * W * itemsize bytes.
    nc_blk = _pick_nc_blk(NC, H, cs, nc_blk_max)
    n_blocks = NC // nc_blk

    x_flat = jnp.reshape(x, (NC * H, W)).astype(matmul_dtype)
    ah_d = jnp.asarray(ah, dtype=matmul_dtype)
    awt_d = jnp.asarray(awt, dtype=matmul_dtype)
    ph_d = jnp.asarray(ph, dtype=matmul_dtype)
    sw_d = jnp.asarray(sw, dtype=matmul_dtype)

    # All randomness in two calls (no python loop, no blocking host<->device transfers).
    nf = float(noise_fac) if noise_fac else 0.0
    k_fac, k_noise = jax.random.split(key)
    facs = jax.random.uniform(k_fac, (cutn,), jnp.float32, 0.0, nf)
    # torch broadcasts facs (cutn,1,1,1) against (cutn*N,...) which assumes N == 1;
    # here the per-cut factor is applied to all N images of that cut.
    noise = jax.random.normal(k_noise, (cutn, NC * cs, cs), dtype=jnp.float32)

    kernel = functools.partial(_pool_noise_kernel, nc_blk=nc_blk, h=H)

    out = pl.pallas_call(
        kernel,
        out_shape=jax.ShapeDtypeStruct((cutn, NC * cs, cs), jnp.float32),
        grid=(n_blocks, cutn),
        in_specs=[
            pl.BlockSpec((nc_blk * H, W), lambda j, i: (j, 0)),       # image block (reused over cuts)
            pl.BlockSpec((W, cs), lambda j, i: (0, 0)),               # avg operator, W axis
            pl.BlockSpec((cs, H), lambda j, i: (0, 0)),               # avg operator, H axis
            pl.BlockSpec(tuple(sw.shape), lambda j, i: (0, 0, 0)),    # max selectors, W axis
            pl.BlockSpec(tuple(ph.shape), lambda j, i: (0, 0, 0)),    # max selectors, H axis
            pl.BlockSpec((1, nc_blk * cs, cs), lambda j, i: (i, j, 0)),  # per-cut noise block
            pl.BlockSpec(memory_space=pltpu.MemorySpace.SMEM),        # per-cut noise factors
        ],
        out_specs=pl.BlockSpec((1, nc_blk * cs, cs), lambda j, i: (i, j, 0)),
        scratch_shapes=[pltpu.VMEM((nc_blk * cs, cs), jnp.float32)],  # pooled cutout (per block)
        compiler_params=pltpu.CompilerParams(
            dimension_semantics=("parallel", "arbitrary")),
    )(x_flat, awt_d, ah_d, sw_d, ph_d, noise, facs)

    # torch.cat(cutouts, dim=0) ordering: all N images of cut 0, then cut 1, ...
    return out.reshape(cutn * N, C, cs, cs)


if __name__ == "__main__":
    key = jax.random.PRNGKey(0)
    k_img, k_cuts = jax.random.split(key)

    N, C, H, W = 2, 4, 16, 16
    cut_size, cutn = 8, 4

    x = jax.random.uniform(k_img, (N, C, H, W), dtype=jnp.float32)

    # --- correctness of the pooling path (noise_fac = 0 -> pure (avg+max)/2 pooling) ---
    # nc_blk_max=4 keeps >= 2 channel blocks so the parallel grid axis / multi-block path runs.
    out0 = make_cutouts_cumin(x, k_cuts, cut_size, cutn, noise_fac=0.0, nc_blk_max=4)
    out0 = jax.block_until_ready(out0)
    kh, kw = H // cut_size, W // cut_size
    xb = x.reshape(N, C, cut_size, kh, cut_size, kw)
    ref = (xb.mean(axis=(3, 5)) + xb.max(axis=(3, 5))) * 0.5
    ref_full = jnp.tile(ref, (cutn, 1, 1, 1))
    max_err = float(jnp.max(jnp.abs(out0 - ref_full)))
    assert out0.shape == (cutn * N, C, cut_size, cut_size), out0.shape
    assert max_err < 2e-2, f"pooling mismatch, max err {max_err}"

    # --- full forward with noise ---
    out = make_cutouts_cumin(x, k_cuts, cut_size, cutn, noise_fac=0.1, nc_blk_max=4)
    out = jax.block_until_ready(out)
    assert out.shape == (cutn * N, C, cut_size, cut_size), out.shape
    assert out.dtype == jnp.float32
    assert bool(jnp.all(jnp.isfinite(out)))

    print("KERNEL_OK")
</pallas_src>

<mosaic_0001>
module attributes {stable_mosaic.version = 11 : i64} {
  func.func @_pool_noise_kernel(%arg0: i32, %arg1: i32, %arg2: memref<64x16xf32, #tpu.memory_space<vmem>>, %arg3: memref<16x8xf32, #tpu.memory_space<vmem>>, %arg4: memref<8x16xf32, #tpu.memory_space<vmem>>, %arg5: memref<2x16x8xf32, #tpu.memory_space<vmem>>, %arg6: memref<2x8x16xf32, #tpu.memory_space<vmem>>, %arg7: memref<1x32x8xf32, #tpu.memory_space<vmem>>, %arg8: memref<4xf32, #tpu.memory_space<smem>>, %arg9: memref<1x32x8xf32, #tpu.memory_space<vmem>>, %arg10: memref<32x8xf32, #tpu.memory_space<vmem>>) attributes {dimension_semantics = [#tpu.dimension_semantics<parallel>, #tpu.dimension_semantics<arbitrary>], iteration_bounds = array<i64: 2, 4>, scalar_prefetch = 0 : i64, scratch_operands = 1 : i64, tpu.core_type = #tpu.core_type<tc>, window_params = [{transform_indices = @transform_0, window_bounds = array<i64: 64, 16>}, {pipeline_mode = #tpu.pipeline_mode<synchronous>, transform_indices = @transform_1, window_bounds = array<i64: 16, 8>}, {pipeline_mode = #tpu.pipeline_mode<synchronous>, transform_indices = @transform_2, window_bounds = array<i64: 8, 16>}, {pipeline_mode = #tpu.pipeline_mode<synchronous>, transform_indices = @transform_3, window_bounds = array<i64: 2, 16, 8>}, {pipeline_mode = #tpu.pipeline_mode<synchronous>, transform_indices = @transform_4, window_bounds = array<i64: 2, 8, 16>}, {transform_indices = @transform_5, window_bounds = array<i64: 1, 32, 8>}, {transform_indices = @transform_6, window_bounds = array<i64: 4>}, {transform_indices = @transform_7, window_bounds = array<i64: 1, 32, 8>}]} {
    %c0_i32 = arith.constant 0 : i32
    %0 = arith.cmpi eq, %arg1, %c0_i32 : i32
    %1 = arith.extui %0 : i1 to i32
    %c0_i32_0 = arith.constant 0 : i32
    %2 = arith.cmpi ne, %1, %c0_i32_0 : i32
    scf.if %2 {
      %c0_8 = arith.constant 0 : index
      %c0_9 = arith.constant 0 : index
      %14 = vector.load %arg2[%c0_8, %c0_9] : memref<64x16xf32, #tpu.memory_space<vmem>>, vector<64x16xf32>
      %c0_10 = arith.constant 0 : index
      %c0_11 = arith.constant 0 : index
      %15 = vector.load %arg3[%c0_10, %c0_11] : memref<16x8xf32, #tpu.memory_space<vmem>>, vector<16x8xf32>
      %cst = arith.constant dense<0.000000e+00> : vector<64x8xf32>
      %16 = tpu.matmul %14, %15, %cst {dimension_numbers = #tpu.dot_dimension_numbers<[1], [0], [0], [1], [0, 0, 1, 1], [], []>} : vector<64x16xf32>, vector<16x8xf32>, vector<64x8xf32> -> vector<64x8xf32>
      %c0_12 = arith.constant 0 : index
      %c0_13 = arith.constant 0 : index
      %c0_14 = arith.constant 0 : index
      %17 = vector.load %arg5[%c0_12, %c0_13, %c0_14] : memref<2x16x8xf32, #tpu.memory_space<vmem>>, vector<1x16x8xf32>
      %18 = vector.shape_cast %17 : vector<1x16x8xf32> to vector<16x8xf32>
      %cst_15 = arith.constant dense<0.000000e+00> : vector<64x8xf32>
      %19 = tpu.matmul %14, %18, %cst_15 {dimension_numbers = #tpu.dot_dimension_numbers<[1], [0], [0], [1], [0, 0, 1, 1], [], []>} : vector<64x16xf32>, vector<16x8xf32>, vector<64x8xf32> -> vector<64x8xf32>
      %c1 = arith.constant 1 : index
      %c0_16 = arith.constant 0 : index
      %c0_17 = arith.constant 0 : index
      %20 = vector.load %arg5[%c1, %c0_16, %c0_17] : memref<2x16x8xf32, #tpu.memory_space<vmem>>, vector<1x16x8xf32>
      %21 = vector.shape_cast %20 : vector<1x16x8xf32> to vector<16x8xf32>
      %cst_18 = arith.constant dense<0.000000e+00> : vector<64x8xf32>
      %22 = tpu.matmul %14, %21, %cst_18 {dimension_numbers = #tpu.dot_dimension_numbers<[1], [0], [0], [1], [0, 0, 1, 1], [], []>} : vector<64x16xf32>, vector<16x8xf32>, vector<64x8xf32> -> vector<64x8xf32>
      %23 = arith.maximumf %19, %22 : vector<64x8xf32>
      %c0_19 = arith.constant 0 : index
      %c0_20 = arith.constant 0 : index
      %24 = vector.load %arg4[%c0_19, %c0_20] : memref<8x16xf32, #tpu.memory_space<vmem>>, vector<8x16xf32>
      %c0_21 = arith.constant 0 : index
      %c0_22 = arith.constant 0 : index
      %c0_23 = arith.constant 0 : index
      %25 = vector.load %arg6[%c0_21, %c0_22, %c0_23] : memref<2x8x16xf32, #tpu.memory_space<vmem>>, vector<1x8x16xf32>
      %26 = vector.shape_cast %25 : vector<1x8x16xf32> to vector<8x16xf32>
      %c1_24 = arith.constant 1 : index
      %c0_25 = arith.constant 0 : index
      %c0_26 = arith.constant 0 : index
      %27 = vector.load %arg6[%c1_24, %c0_25, %c0_26] : memref<2x8x16xf32, #tpu.memory_space<vmem>>, vector<1x8x16xf32>
      %28 = vector.shape_cast %27 : vector<1x8x16xf32> to vector<8x16xf32>
      %29 = vector.extract_strided_slice %16 {offsets = [0, 0], sizes = [16, 8], strides = [1, 1]} : vector<64x8xf32> to vector<16x8xf32>
      %30 = vector.extract_strided_slice %23 {offsets = [0, 0], sizes = [16, 8], strides = [1, 1]} : vector<64x8xf32> to vector<16x8xf32>
      %cst_27 = arith.constant dense<0.000000e+00> : vector<8x8xf32>
      %31 = tpu.matmul %24, %29, %cst_27 {dimension_numbers = #tpu.dot_dimension_numbers<[1], [0], [0], [1], [0, 0, 1, 1], [], []>} : vector<8x16xf32>, vector<16x8xf32>, vector<8x8xf32> -> vector<8x8xf32>
      %cst_28 = arith.constant dense<0.000000e+00> : vector<8x8xf32>
      %32 = tpu.matmul %26, %30, %cst_28 {dimension_numbers = #tpu.dot_dimension_numbers<[1], [0], [0], [1], [0, 0, 1, 1], [], []>} : vector<8x16xf32>, vector<16x8xf32>, vector<8x8xf32> -> vector<8x8xf32>
      %cst_29 = arith.constant dense<0.000000e+00> : vector<8x8xf32>
      %33 = tpu.matmul %28, %30, %cst_29 {dimension_numbers = #tpu.dot_dimension_numbers<[1], [0], [0], [1], [0, 0, 1, 1], [], []>} : vector<8x16xf32>, vector<16x8xf32>, vector<8x8xf32> -> vector<8x8xf32>
      %34 = arith.maximumf %32, %33 : vector<8x8xf32>
      %35 = arith.addf %31, %34 : vector<8x8xf32>
      %cst_30 = arith.constant 5.000000e-01 : f32
      %36 = vector.broadcast %cst_30 : f32 to vector<8x8xf32>
      %37 = arith.mulf %35, %36 : vector<8x8xf32>
      %c0_31 = arith.constant 0 : index
      %c0_32 = arith.constant 0 : index
      %38 = vector.load %arg10[%c0_31, %c0_32] : memref<32x8xf32, #tpu.memory_space<vmem>>, vector<8x8xf32>
      tpu.vector_store %arg10[%c0_31, %c0_32], %37 {strides = array<i32>} : memref<32x8xf32, #tpu.memory_space<vmem>>, vector<8x8xf32>,
      %39 = vector.extract_strided_slice %16 {offsets = [16, 0], sizes = [16, 8], strides = [1, 1]} : vector<64x8xf32> to vector<16x8xf32>
      %40 = vector.extract_strided_slice %23 {offsets = [16, 0], sizes = [16, 8], strides = [1, 1]} : vector<64x8xf32> to vector<16x8xf32>
      %cst_33 = arith.constant dense<0.000000e+00> : vector<8x8xf32>
      %41 = tpu.matmul %24, %39, %cst_33 {dimension_numbers = #tpu.dot_dimension_numbers<[1], [0], [0], [1], [0, 0, 1, 1], [], []>} : vector<8x16xf32>, vector<16x8xf32>, vector<8x8xf32> -> vector<8x8xf32>
      %cst_34 = arith.constant dense<0.000000e+00> : vector<8x8xf32>
      %42 = tpu.matmul %26, %40, %cst_34 {dimension_numbers = #tpu.dot_dimension_numbers<[1], [0], [0], [1], [0, 0, 1, 1], [], []>} : vector<8x16xf32>, vector<16x8xf32>, vector<8x8xf32> -> vector<8x8xf32>
      %cst_35 = arith.constant dense<0.000000e+00> : vector<8x8xf32>
      %43 = tpu.matmul %28, %40, %cst_35 {dimension_numbers = #tpu.dot_dimension_numbers<[1], [0], [0], [1], [0, 0, 1, 1], [], []>} : vector<8x16xf32>, vector<16x8xf32>, vector<8x8xf32> -> vector<8x8xf32>
      %44 = arith.maximumf %42, %43 : vector<8x8xf32>
      %45 = arith.addf %41, %44 : vector<8x8xf32>
      %cst_36 = arith.constant 5.000000e-01 : f32
      %46 = vector.broadcast %cst_36 : f32 to vector<8x8xf32>
      %47 = arith.mulf %45, %46 : vector<8x8xf32>
      %c8 = arith.constant 8 : index
      %c0_37 = arith.constant 0 : index
      %48 = vector.load %arg10[%c8, %c0_37] : memref<32x8xf32, #tpu.memory_space<vmem>>, vector<8x8xf32>
      tpu.vector_store %arg10[%c8, %c0_37], %47 {strides = array<i32>} : memref<32x8xf32, #tpu.memory_space<vmem>>, vector<8x8xf32>,
      %49 = vector.extract_strided_slice %16 {offsets = [32, 0], sizes = [16, 8], strides = [1, 1]} : vector<64x8xf32> to vector<16x8xf32>
      %50 = vector.extract_strided_slice %23 {offsets = [32, 0], sizes = [16, 8], strides = [1, 1]} : vector<64x8xf32> to vector<16x8xf32>
      %cst_38 = arith.constant dense<0.000000e+00> : vector<8x8xf32>
      %51 = tpu.matmul %24, %49, %cst_38 {dimension_numbers = #tpu.dot_dimension_numbers<[1], [0], [0], [1], [0, 0, 1, 1], [], []>} : vector<8x16xf32>, vector<16x8xf32>, vector<8x8xf32> -> vector<8x8xf32>
      %cst_39 = arith.constant dense<0.000000e+00> : vector<8x8xf32>
      %52 = tpu.matmul %26, %50, %cst_39 {dimension_numbers = #tpu.dot_dimension_numbers<[1], [0], [0], [1], [0, 0, 1, 1], [], []>} : vector<8x16xf32>, vector<16x8xf32>, vector<8x8xf32> -> vector<8x8xf32>
      %cst_40 = arith.constant dense<0.000000e+00> : vector<8x8xf32>
      %53 = tpu.matmul %28, %50, %cst_40 {dimension_numbers = #tpu.dot_dimension_numbers<[1], [0], [0], [1], [0, 0, 1, 1], [], []>} : vector<8x16xf32>, vector<16x8xf32>, vector<8x8xf32> -> vector<8x8xf32>
      %54 = arith.maximumf %52, %53 : vector<8x8xf32>
      %55 = arith.addf %51, %54 : vector<8x8xf32>
      %cst_41 = arith.constant 5.000000e-01 : f32
      %56 = vector.broadcast %cst_41 : f32 to vector<8x8xf32>
      %57 = arith.mulf %55, %56 : vector<8x8xf32>
      %c16 = arith.constant 16 : index
      %c0_42 = arith.constant 0 : index
      %58 = vector.load %arg10[%c16, %c0_42] : memref<32x8xf32, #tpu.memory_space<vmem>>, vector<8x8xf32>
      tpu.vector_store %arg10[%c16, %c0_42], %57 {strides = array<i32>} : memref<32x8xf32, #tpu.memory_space<vmem>>, vector<8x8xf32>,
      %59 = vector.extract_strided_slice %16 {offsets = [48, 0], sizes = [16, 8], strides = [1, 1]} : vector<64x8xf32> to vector<16x8xf32>
      %60 = vector.extract_strided_slice %23 {offsets = [48, 0], sizes = [16, 8], strides = [1, 1]} : vector<64x8xf32> to vector<16x8xf32>
      %cst_43 = arith.constant dense<0.000000e+00> : vector<8x8xf32>
      %61 = tpu.matmul %24, %59, %cst_43 {dimension_numbers = #tpu.dot_dimension_numbers<[1], [0], [0], [1], [0, 0, 1, 1], [], []>} : vector<8x16xf32>, vector<16x8xf32>, vector<8x8xf32> -> vector<8x8xf32>
      %cst_44 = arith.constant dense<0.000000e+00> : vector<8x8xf32>
      %62 = tpu.matmul %26, %60, %cst_44 {dimension_numbers = #tpu.dot_dimension_numbers<[1], [0], [0], [1], [0, 0, 1, 1], [], []>} : vector<8x16xf32>, vector<16x8xf32>, vector<8x8xf32> -> vector<8x8xf32>
      %cst_45 = arith.constant dense<0.000000e+00> : vector<8x8xf32>
      %63 = tpu.matmul %28, %60, %cst_45 {dimension_numbers = #tpu.dot_dimension_numbers<[1], [0], [0], [1], [0, 0, 1, 1], [], []>} : vector<8x16xf32>, vector<16x8xf32>, vector<8x8xf32> -> vector<8x8xf32>
      %64 = arith.maximumf %62, %63 : vector<8x8xf32>
      %65 = arith.addf %61, %64 : vector<8x8xf32>
      %cst_46 = arith.constant 5.000000e-01 : f32
      %66 = vector.broadcast %cst_46 : f32 to vector<8x8xf32>
      %67 = arith.mulf %65, %66 : vector<8x8xf32>
      %c24 = arith.constant 24 : index
      %c0_47 = arith.constant 0 : index
      %68 = vector.load %arg10[%c24, %c0_47] : memref<32x8xf32, #tpu.memory_space<vmem>>, vector<8x8xf32>
      tpu.vector_store %arg10[%c24, %c0_47], %67 {strides = array<i32>} : memref<32x8xf32, #tpu.memory_space<vmem>>, vector<8x8xf32>,
    } else {
    }
    %c0 = arith.constant 0 : index
    %c0_1 = arith.constant 0 : index
    %3 = vector.load %arg10[%c0, %c0_1] : memref<32x8xf32, #tpu.memory_space<vmem>>, vector<32x8xf32>
    %4 = arith.index_cast %arg1 : i32 to index
    %5 = memref.load %arg8[%4] : memref<4xf32, #tpu.memory_space<smem>>
    %c0_2 = arith.constant 0 : index
    %c0_3 = arith.constant 0 : index
    %c0_4 = arith.constant 0 : index
    %6 = vector.load %arg7[%c0_2, %c0_3, %c0_4] : memref<1x32x8xf32, #tpu.memory_space<vmem>>, vector<1x32x8xf32>
    %7 = vector.shape_cast %6 : vector<1x32x8xf32> to vector<32x8xf32>
    %8 = vector.broadcast %5 : f32 to vector<32x8xf32>
    %9 = arith.mulf %8, %7 : vector<32x8xf32>
    %10 = arith.addf %3, %9 : vector<32x8xf32>
    %c0_5 = arith.constant 0 : index
    %c0_6 = arith.constant 0 : index
    %c0_7 = arith.constant 0 : index
    %11 = vector.load %arg9[%c0_5, %c0_6, %c0_7] : memref<1x32x8xf32, #tpu.memory_space<vmem>>, vector<1x32x8xf32>
    %12 = vector.shape_cast %11 : vector<1x32x8xf32> to vector<32x8xf32>
    %13 = vector.shape_cast %10 : vector<32x8xf32> to vector<1x32x8xf32>
    tpu.vector_store %arg9[%c0_5, %c0_6, %c0_7], %13 {strides = array<i32>} : memref<1x32x8xf32, #tpu.memory_space<vmem>>, vector<1x32x8xf32>,
    return
  }
  func.func @transform_0(%arg0: i32, %arg1: i32) -> (i32, i32) {
    %c0_i32 = arith.constant 0 : i32
    %c0_i32_0 = arith.constant 0 : i32
    return %arg0, %c0_i32 : i32, i32
  }
  func.func @transform_1(%arg0: i32, %arg1: i32) -> (i32, i32) {
    %c0_i32 = arith.constant 0 : i32
    %c0_i32_0 = arith.constant 0 : i32
    %c0_i32_1 = arith.constant 0 : i32
    return %c0_i32, %c0_i32_0 : i32, i32
  }
  func.func @transform_2(%arg0: i32, %arg1: i32) -> (i32, i32) {
    %c0_i32 = arith.constant 0 : i32
    %c0_i32_0 = arith.constant 0 : i32
    %c0_i32_1 = arith.constant 0 : i32
    return %c0_i32, %c0_i32_0 : i32, i32
  }
  func.func @transform_3(%arg0: i32, %arg1: i32) -> (i32, i32, i32) {
    %c0_i32 = arith.constant 0 : i32
    %c0_i32_0 = arith.constant 0 : i32
    %c0_i32_1 = arith.constant 0 : i32
    %c0_i32_2 = arith.constant 0 : i32
    return %c0_i32, %c0_i32_0, %c0_i32_1 : i32, i32, i32
  }
  func.func @transform_4(%arg0: i32, %arg1: i32) -> (i32, i32, i32) {
    %c0_i32 = arith.constant 0 : i32
    %c0_i32_0 = arith.constant 0 : i32
    %c0_i32_1 = arith.constant 0 : i32
    %c0_i32_2 = arith.constant 0 : i32
    return %c0_i32, %c0_i32_0, %c0_i32_1 : i32, i32, i32
  }
  func.func @transform_5(%arg0: i32, %arg1: i32) -> (i32, i32, i32) {
    %c0_i32 = arith.constant 0 : i32
    %c0_i32_0 = arith.constant 0 : i32
    return %arg1, %arg0, %c0_i32 : i32, i32, i32
  }
  func.func @transform_6(%arg0: i32, %arg1: i32) -> i32 {
    %c0_i32 = arith.constant 0 : i32
    %c0_i32_0 = arith.constant 0 : i32
    return %c0_i32 : i32
  }
  func.func @transform_7(%arg0: i32, %arg1: i32) -> (i32, i32, i32) {
    %c0_i32 = arith.constant 0 : i32
    %c0_i32_0 = arith.constant 0 : i32
    return %arg1, %arg0, %c0_i32 : i32, i32, i32
  }
}

</mosaic_0001>

<bundles_post_ra>
// kernel: tpu_custom_call.1
= control target key start
LH: loop header
LB: loop body
LE: loop exit
PB: predicated region body
PF: predicated region fallthrough
CT: control target
= control target key end

     0   :  { %12 = vsyncpa [#allocation4], 0  ;;  %s2184_s24 = smov 0   ;;  %s2186_s25 = smov 0   ;;  %s2410_s0 = inlined_call_operand.vmem [shape: f32[128,16], index: 0, kind: input, shape index: {}]   ;;  %s2411_s1 = inlined_call_operand.vmem [shape: f32[16,8], index: 1, kind: input, shape index: {}]   ;;  %s2412_s2 = inlined_call_operand.vmem [shape: f32[8,16], index: 2, kind: input, shape index: {}]   ;;  %s2413_s3 = inlined_call_operand.vmem [shape: f32[2,16,8], index: 3, kind: input, shape index: {}]   ;;  %s2414_s4 = inlined_call_operand.vmem [shape: f32[2,8,16], index: 4, kind: input, shape index: {}]   ;;  %s2415_s5 = inlined_call_operand.vmem [shape: f32[4,64,8], index: 5, kind: input, shape index: {}]   ;;  %s2416_s6 = inlined_call_operand.vmem [shape: f32[4], index: 6, kind: input, shape index: {}]   ;;  %s2417_s7 = inlined_call_operand.vmem [shape: f32[4,64,8], index: 7, kind: output, shape index: {}]  }
   0x1   :  { %s2188_s26 = smov 0   ;;  %s2190_s27 = smov 0  }
   0x2   :  { %s2192_s28 = smov 0  }
   0x3 LB: > { %s1724_s29 = sadd.s32 4294967295, %s2138_s28   ;;  %s27_s30 = sadd.s32 1, %s2130_s26  ;;  %s2138_s28 = sphi %s2192_s28, %s18_s28   ;;  %s2134_s27 = sphi %s2190_s27, %s2423_s27   ;;  %s2130_s26 = sphi %s2188_s26, %s2422_s26   ;;  %s2126_s25 = sphi %s2186_s25, %s2421_s25   ;;  %s2122_s24 = sphi %s2184_s24, %s2420_s24  }
   0x4   : > { %p28_p0 = scmp.ge.s32.totalorder %s27_s30, 4  ;;  %s30_s8 = sadd.s32 1, %s2134_s27 }
   0x5   : > { %p1726_p1 = scmp.ge.s32.totalorder %s2138_s28, 1  ;;  %p222_p2 = scmp.lt.s32.totalorder %s2138_s28, 9 }
   0x6   : > { %s2425_s30 = smov (%p28_p0, %s27_s30), 0  ;;  %s2427_s8 = smov (!%p28_p0, %s30_s8), %s2134_s27 }
   0x7   : > { %p2217_p3 = pnand %p1726_p1, %p222_p2  ;;  %p32_p4 = scmp.ge.s32.totalorder %s2427_s8, 2 }
   0x8   : > { %p2221_p5 = scmp.eq.s32.totalorder %s1724_s29, 0  ;;  %s247_s13 = sshll.u32 %s2416_s6, 4  ;;  %s248_s13 = int_to_ptr.vmem [resolvable:$true] %s247_s13 }
   0x9   : > { %p2031_p6 = pneg %p2217_p3  ;;  %s2429_s8 = smov (%p32_p4, %s2427_s8), 0 }
   0xa   : > { %s2081_s14 = scalar_lea.vmem %s248_s13, 16  ;;  %p2089_p12 = scmp.lt.s32.totalorder %s248_s13, %s248_s13 }
   0xb   : > { %p2032_p7 = pnand %p2221_p5, %p2031_p6  ;;  %p2082_p8 = scmp.ne.s32.totalorder %s248_s13, %s2081_s14 }
   0xc   : > { %p2090_p13 = scmp.lt.s32.totalorder %s2081_s14, %s2081_s14 }
   0xd   : > { %p2083_p9 = pneg %p2032_p7 }
   0xe   : > { %p2091_p0 = por %p2090_p13, %p2089_p12 }
   0xf   : > { %p2084_p10 = pnand %p2083_p9, %p2082_p8 }
  0x11   : > { %p2085_p11 = pneg %p2084_p10 }
  0x13   : > { %p2092_p1 = pnand %p2091_p0, %p2085_p11 }
  0x15   : > { %2095 = shalt.err (!%p2092_p1)
}
  0x16   : > { %s2140_s15 = smov [#allocation3]   ;;  %282 = sbr.rel (%p2217_p3) target bundleno = 538 (0x21a), region = 48 }
  0x17   : > { %2034 = dma.vmem_to_smem (!%p2032_p7), %s248_s13, 16, %s2140_s15, [#allocation4]  }
  0x1d   : > { %2117 = dma.done.wait (%p2221_p5), [#allocation4], 16  }
  0x1e   : > { %2119 = vsyncadd (%p2221_p5), [#allocation4], 4294967280 }
  0x1f   : > { %288 = sfence }
  0x20   : > { %s1731_s16 = sshll.u32 %s2126_s25, 3  ;;  %s1733_s17 = sshll.u32 %s2126_s25, 2 }
  0x21   : > { %p329_p2 = scmp.lt.s32.totalorder %s1731_s16, 15  ;;  %p335_p4 = scmp.lt.s32.totalorder %s2122_s24, 3 }
  0x22   : > { %p337_p6 = scmp.lt.s32.totalorder %s1733_s17, 7  ;;  %p1739_p3 = scmp.ne.s32.totalorder %s2122_s24, 0 }
  0x23   : > { %s2431_s16 = smov (!%p329_p2, %s1731_s16), 15  ;;  %v366_v0 = vld [vmem:[%s2411_s1] sm:$0xff] (!%p1739_p3)  ;;  %v367_v1 = vld [vmem:[%s2411_s1 + $0x8] sm:$0xff] (!%p1739_p3)  ;;  %vm368_vm0 = vcmask (!%p1739_p3), 130048   ;;  %v1756_v8 = vld [vmem:[%s2413_s3 + $0x10] sm:$0xff] (!%p1739_p3)  ;;  %v2141_v17 = vmov (!%p1739_p3), 0.0|0.0  }
  0x24   : > { %s336_s18 = scalar_select %p335_p4, %s2122_s24, 3 }
  0x25   : > { %s1732_s19 = sshll.u32 %s2431_s16, 3  ;;  %s2433_s17 = smov (!%p337_p6, %s1733_s17), 7  ;;  %v1979_v3 = vpack.c.bf16 (!%p1739_p3), %v367_v1, %v366_v0  ;;  %v498_v4 = vld [vmem:[%s2413_s3] sm:$0xff] (!%p1739_p3)  ;;  %v499_v5 = vld [vmem:[%s2413_s3 + $0x8] sm:$0xff] (!%p1739_p3)  ;;  %v1757_v9 = vld [vmem:[%s2413_s3 + $0x18] sm:$0xff] (!%p1739_p3)  ;;  %vm2142_vm1 = vmmov (!%p1739_p3), 0  }
  0x26   : > { %s2247_s22 = scalar_lea.vmem %s2410_s0, %s1732_s19  ;;  %s1734_s23 = sshll.u32 %s336_s18, 3  ;;  %v1983_v7 = vpack.c.bf16 (!%p1739_p3), %v499_v5, %v498_v4  ;;  %v1987_v11 = vpack.c.bf16 (!%p1739_p3), %v1757_v9, %v1756_v8  ;;  %v2143_v18 = vmov (!%p1739_p3), 0.0   ;;  %v722_v48 = vld [vmem:[%s2414_s4] sm:$0xff] (!%p1739_p3)  ;;  %v1766_v54 = vld [vmem:[%s2414_s4 + $0x8] sm:$0xff] (!%p1739_p3)  ;;  %vm946_vm2 = vcmask (!%p1739_p3), 64512  }
  0x27   : > { %s340_s29 = sadd.s32 %s1734_s23, %s2433_s17  ;;  %357 = sbr.rel (%p1739_p3) target bundleno = 525 (0x20d), region = 56  ;;  %v358_v2 = vld [vmem:[%s2247_s22] sm:$0xff] (!%p1739_p3)  ;;  %1980 = vmatprep.subr.bf16.mxu0 (!%p1739_p3), %v1979_v3  ;;  %v359_v6 = vld [vmem:[%s2247_s22 + $0x8] sm:$0xff] (!%p1739_p3)  ;;  %v360_v10 = vld [vmem:[%s2247_s22 + $0x10] sm:$0xff] (!%p1739_p3) }
  0x28   : > { %s1735_s9 = sshll.u32 %s340_s29, 3  ;;  %1851 = vmatprep.mubr.msk.f32.mxu0 (!%p1739_p3), %vm368_vm0, %v358_v2  ;;  %1867 = vmatprep.mubr.msk.f32.mxu1 (!%p1739_p3), %vm368_vm0, %v358_v2  ;;  %v361_v12 = vld [vmem:[%s2247_s22 + $0x18] sm:$0xff] (!%p1739_p3)  ;;  %v362_v13 = vld [vmem:[%s2247_s22 + $0x20] sm:$0xff] (!%p1739_p3)  ;;  %v363_v14 = vld [vmem:[%s2247_s22 + $0x28] sm:$0xff] (!%p1739_p3) }
  0x29   : > { %s2252_s12 = scalar_lea.vmem %s2415_s5, %s1735_s9  ;;  %s2257_s14 = scalar_lea.vmem %s2417_s7, %s1735_s9  ;;  %1982 = vmatpush3.bf16.msra.mxu0 (!%p1739_p3), %v1979_v3  ;;  %1984 = vmatprep.subr.bf16.mxu1 (!%p1739_p3), %v1983_v7  ;;  %v364_v15 = vld [vmem:[%s2247_s22 + $0x30] sm:$0xff] (!%p1739_p3)  ;;  %v365_v16 = vld [vmem:[%s2247_s22 + $0x38] sm:$0xff] (!%p1739_p3)  ;;  %v721_v59 = vld [vmem:[%s2412_s2] sm:$0xff] (!%p1739_p3) }
  0x2a   : > { %1986 = vmatpush3.bf16.msra.mxu1 (!%p1739_p3), %v1983_v7  ;;  %1988 = vmatprep.subr.bf16.mxu0 (!%p1739_p3), %v1987_v11 }
  0x2b   : > { %1991 = vmatprep.subr.bf16.mxu1 (!%p1739_p3), %v2141_v17 }
  0x2c   : > { %1852 = vmatmul.mubr.msk.f32.vlgmr.msra.gmra.mrb[0].mxu0 (!%p1739_p3), %vm368_vm0, %v359_v6 }
  0x2d   : > { %1854 = vmatprep.mubr.msk.f32.mxu0 (!%p1739_p3), %vm368_vm0, %v360_v10  ;;  %1990 = vmatpush3.bf16.msra.mxu0 (!%p1739_p3), %v1987_v11 }
  0x2e   : > { %1868 = vmatmul.mubr.msk.f32.vlgmr.msra.gmra.mrb[0].mxu1 %vm368_vm0, %v359_v6  ;;  %2003 = vmatprep.subr.bf16.mxu0 %v2141_v17 }
  0x2f   : > { %1870 = vmatprep.mubr.msk.f32.mxu1 %vm368_vm0, %v360_v10 }
  0x30   : > { %1855 = vmatmul.mubr.msk.f32.gmra.mrb[2].mxu0 %vm368_vm0, %v361_v12 }
  0x31   : > { %1857 = vmatprep.mubr.msk.f32.mxu0 %vm368_vm0, %v362_v13 }
  0x32   : > { %1871 = vmatmul.mubr.msk.f32.gmra.mrb[2].mxu1 %vm368_vm0, %v361_v12 }
  0x33   : > { %1873 = vmatprep.mubr.msk.f32.mxu1 %vm368_vm0, %v362_v13 }
  0x34   : > { %1858 = vmatmul.mubr.msk.f32.gmra.mrb[4].mxu0 %vm368_vm0, %v363_v14 }
  0x35   : > { %1860 = vmatprep.mubr.msk.f32.mxu0 %vm368_vm0, %v364_v15 }
  0x36   : > { %1874 = vmatmul.mubr.msk.f32.gmra.mrb[4].mxu1 %vm368_vm0, %v363_v14 }
  0x37   : > { %1876 = vmatprep.mubr.msk.f32.mxu1 %vm368_vm0, %v364_v15 }
  0x38   : > { %1861 = vmatmul.mubr.msk.f32.gmra.mrb[6].mxu0 %vm368_vm0, %v365_v16 }
  0x39   : > { %1883 = vmatprep.mubr.msk.f32.mxu0 %vm368_vm0, %v358_v2 }
  0x3a   : > { %1877 = vmatmul.mubr.msk.f32.gmra.mrb[6].mxu1 %vm368_vm0, %v365_v16 }
  0x3b   : > { %1899 = vmatprep.mubr.msk.f32.mxu1 %vm2142_vm1, %v2143_v18 }
  0x3c   : > { %1884 = vmatmul.mubr.msk.f32.vlgmr.msra.gmra.mrb[8].mxu0 %vm368_vm0, %v359_v6 }
  0x3d   : > { %1886 = vmatprep.mubr.msk.f32.mxu0 %vm368_vm0, %v360_v10 }
  0x40   : > { %1887 = vmatmul.mubr.msk.f32.gmra.mrb[10].mxu0 %vm368_vm0, %v361_v12 }
  0x41   : > { %1889 = vmatprep.mubr.msk.f32.mxu0 %vm368_vm0, %v362_v13 }
  0x44   : > { %1890 = vmatmul.mubr.msk.f32.gmra.mrb[12].mxu0 %vm368_vm0, %v363_v14 }
  0x45   : > { %1892 = vmatprep.mubr.msk.f32.mxu0 %vm368_vm0, %v364_v15 }
  0x48   : > { %1893 = vmatmul.mubr.msk.f32.gmra.mrb[14].mxu0 %vm368_vm0, %v365_v16 }
  0x49   : > { %1927 = vmatprep.mubr.msk.f32.mxu0 %vm2142_vm1, %v2143_v18 }
  0xff   : > { %v1853_v19 = vpop.f32.mrb[0].mxu0 }
 0x100   : > { %v459_v20 = vpop.f32.mrb[1].mxu0 }
 0x101   : > { %v1998_v21 = vpack.c.bf16 %v1853_v19, %v459_v20  ;;  %v1869_v22 = vpop.f32.mrb[0].mxu1 }
 0x102   : > { %v566_v24 = vpop.f32.mrb[1].mxu1 }
 0x103   : > { %v2316_v23 = vpop.f32.mrb[2].mxu0 }
 0x104   : > { %v2318_v25 = vpop.f32.mrb[3].mxu0 }
 0x105   : > { %v2007_v26 = vpack.c.bf16 %v2316_v23, %v2318_v25  ;;  %v1872_v27 = vpop.f32.mrb[2].mxu1 }
 0x106   : > { %v576_v29 = vpop.f32.mrb[3].mxu1 }
 0x107   : > { %v1859_v28 = vpop.f32.mrb[4].mxu0 }
 0x108   : > { %v479_v30 = vpop.f32.mrb[5].mxu0 }
 0x109   : > { %v2016_v31 = vpack.c.bf16 %v1859_v28, %v479_v30  ;;  %v1875_v32 = vpop.f32.mrb[4].mxu1 }
 0x10a   : > { %v586_v34 = vpop.f32.mrb[5].mxu1 }
 0x10b   : > { %v2322_v33 = vpop.f32.mrb[6].mxu0 }
 0x10c   : > { %v2324_v35 = vpop.f32.mrb[7].mxu0 }
 0x10d   : > { %v2025_v36 = vpack.c.bf16 %v2322_v33, %v2324_v35  ;;  %v1878_v37 = vpop.f32.mrb[6].mxu1 }
 0x10e   : > { %v596_v39 = vpop.f32.mrb[7].mxu1 }
 0x10f   : > { %v1885_v38 = vpop.f32.mrb[8].mxu0 }
 0x110   : > { %v714_v40 = vmax.f32 %v1869_v22, %v1885_v38  ;;  %v674_v41 = vpop.f32.mrb[9].mxu0 }
 0x111   : > { %v713_v42 = vmax.f32 %v566_v24, %v674_v41 }
 0x113   : > { %v1992_v43 = vpack.c.bf16 %v714_v40, %v713_v42  ;;  %v1888_v44 = vpop.f32.mrb[10].mxu0 }
 0x114   : > { %v716_v45 = vmax.f32 %v1872_v27, %v1888_v44  ;;  %v684_v46 = vpop.f32.mrb[11].mxu0 }
 0x115   : > { %v715_v47 = vmax.f32 %v576_v29, %v684_v46  ;;  %1993 = vmatpush3.bf16.msra.mxu1 %v1992_v43 }
 0x116   : > { %1994 = vmatprep.subr.bf16.mxu1 %v2141_v17 }
 0x117   : > { %v2001_v49 = vpack.c.bf16 %v716_v45, %v715_v47  ;;  %v1891_v50 = vpop.f32.mrb[12].mxu0 }
 0x118   : > { %v718_v51 = vmax.f32 %v1875_v32, %v1891_v50  ;;  %v694_v52 = vpop.f32.mrb[13].mxu0  ;;  %1900 = vmatmul.mubr.msk.f32.vlgmr.msra.gmra.mrb[8].mxu1 %vm368_vm0, %v722_v48 }
 0x119   : > { %v717_v53 = vmax.f32 %v586_v34, %v694_v52  ;;  %1996 = vmatpush3.bf16.msra.mxu1 %v1992_v43  ;;  %2005 = vmatpush3.bf16.msra.mxu0 %v2001_v49 }
 0x11a   : > { %1906 = vmatprep.mubr.msk.f32.mxu1 %vm2142_vm1, %v2143_v18  ;;  %1997 = vmatprep.subr.bf16.mxu1 %v2141_v17 }
 0x11b   : > { %v2010_v55 = vpack.c.bf16 %v718_v51, %v717_v53  ;;  %2009 = vmatprep.subr.bf16.mxu0 %v2141_v17  ;;  %v1894_v56 = vpop.f32.mrb[14].mxu0 }
 0x11c   : > { %1907 = vmatmul.mubr.msk.f32.vlgmr.msra.gmra.mrb[10].mxu1 %vm368_vm0, %v1766_v54  ;;  %1928 = vmatmul.mubr.msk.f32.vlgmr.msra.gmra.mrb[16].mxu0 %vm368_vm0, %v1766_v54  ;;  %v720_v57 = vmax.f32 %v1878_v37, %v1894_v56  ;;  %v704_v58 = vpop.f32.mrb[15].mxu0 }
 0x11d   : > { %1999 = vmatpush3.bf16.msra.mxu1 %v1998_v21  ;;  %2011 = vmatpush3.bf16.msra.mxu0 %v2010_v55  ;;  %v719_v60 = vmax.f32 %v596_v39, %v704_v58 }
 0x11e   : > { %1913 = vmatprep.mubr.msk.f32.mxu1 %vm2142_vm1, %v2143_v18  ;;  %2000 = vmatprep.subr.bf16.mxu1 %v2141_v17 }
 0x11f   : > { %1941 = vmatprep.mubr.msk.f32.mxu0 %vm2142_vm1, %v2143_v18  ;;  %2015 = vmatprep.subr.bf16.mxu0 %v2141_v17  ;;  %v2019_v61 = vpack.c.bf16 %v720_v57, %v719_v60 }
 0x120   : > { %1914 = vmatmul.mubr.msk.f32.vlgmr.msra.gmra.mrb[12].mxu1 %vm368_vm0, %v721_v59  ;;  %1942 = vmatmul.mubr.msk.f32.vlgmr.msra.gmra.mrb[18].mxu0 %vm368_vm0, %v722_v48 }
 0x121   : > { %2002 = vmatpush3.bf16.msra.mxu1 %v2001_v49  ;;  %2017 = vmatpush3.bf16.msra.mxu0 %v2016_v31 }
 0x122   : > { %1920 = vmatprep.mubr.msk.f32.mxu1 %vm2142_vm1, %v2143_v18  ;;  %2006 = vmatprep.subr.bf16.mxu1 %v2141_v17 }
 0x123   : > { %1955 = vmatprep.mubr.msk.f32.mxu0 %vm2142_vm1, %v2143_v18  ;;  %2021 = vmatprep.subr.bf16.mxu0 %v2141_v17 }
 0x124   : > { %1921 = vmatmul.mubr.msk.f32.vlgmr.msra.gmra.mrb[14].mxu1 %vm368_vm0, %v722_v48  ;;  %1956 = vmatmul.mubr.msk.f32.vlgmr.msra.gmra.mrb[20].mxu0 %vm368_vm0, %v721_v59 }
 0x125   : > { %2008 = vmatpush3.bf16.msra.mxu1 %v2007_v26  ;;  %1934 = vmatprep.mubr.msk.f32.mxu1 %vm2142_vm1, %v2143_v18 }
 0x126   : > { %2012 = vmatprep.subr.bf16.mxu1 %v2141_v17  ;;  %2023 = vmatpush3.bf16.msra.mxu0 %v2019_v61 }
 0x127   : > { %1969 = vmatprep.mubr.msk.f32.mxu0 %vm2142_vm1, %v2143_v18 }
 0x128   : > { %1935 = vmatmul.mubr.msk.f32.vlgmr.msra.gmra.mrb[16].mxu1 %vm368_vm0, %v721_v59 }
 0x129   : > { %2014 = vmatpush3.bf16.msra.mxu1 %v2010_v55  ;;  %1948 = vmatprep.mubr.msk.f32.mxu1 %vm2142_vm1, %v2143_v18 }
 0x12a   : > { %2018 = vmatprep.subr.bf16.mxu1 %v2141_v17  ;;  %1970 = vmatmul.mubr.msk.f32.vlgmr.msra.gmra.mrb[22].mxu0 %vm368_vm0, %v1766_v54 }
 0x12c   : > { %1949 = vmatmul.mubr.msk.f32.vlgmr.msra.gmra.mrb[18].mxu1 %vm368_vm0, %v1766_v54 }
 0x12d   : > { %2020 = vmatpush3.bf16.msra.mxu1 %v2019_v61  ;;  %1962 = vmatprep.mubr.msk.f32.mxu1 %vm2142_vm1, %v2143_v18 }
 0x12e   : > { %2024 = vmatprep.subr.bf16.mxu1 %v2141_v17 }
 0x130   : > { %1963 = vmatmul.mubr.msk.f32.vlgmr.msra.gmra.mrb[20].mxu1 %vm368_vm0, %v722_v48 }
 0x131   : > { %2026 = vmatpush3.bf16.msra.mxu1 %v2025_v36  ;;  %1976 = vmatprep.mubr.msk.f32.mxu1 %vm2142_vm1, %v2143_v18 }
 0x134   : > { %1977 = vmatmul.mubr.msk.f32.vlgmr.msra.gmra.mrb[22].mxu1 %vm368_vm0, %v721_v59 }
 0x1eb   : > { %v794_v62 = vpop.f32.mrb[8].mxu1 }
 0x1ec   : > { %v1901_v63 = vpop.f32.mrb[9].mxu1 }
 0x1ef   : > { %v867_v0 = vpop.f32.mrb[10].mxu1  ;;  %v1084_v1 = vpop.f32.mrb[16].mxu0 }
 0x1f0   : > { %v871_v2 = vmax.f32 %v794_v62, %v867_v0  ;;  %v1908_v3 = vpop.f32.mrb[11].mxu1  ;;  %v1929_v4 = vpop.f32.mrb[17].mxu0 }
 0x1f3   : > { %v941_v5 = vpop.f32.mrb[12].mxu1  ;;  %v1227_v6 = vpop.f32.mrb[18].mxu0 }
 0x1f4   : > { %v942_v7 = vadd.f32 %v941_v5, %v871_v2  ;;  %v1915_v8 = vpop.f32.mrb[13].mxu1  ;;  %v1943_v9 = vpop.f32.mrb[19].mxu0 }
 0x1f6   : > { %v945_v10 = vmul.f32 0.5, %v942_v7 }
 0x1f7   : > { %v1014_v11 = vpop.f32.mrb[14].mxu1  ;;  %v1368_v12 = vpop.f32.mrb[20].mxu0 }
 0x1f8   : > { %947 = vst.msk [vmem:[#allocation2] sm:$0xff] %vm946_vm2, %v945_v10  ;;  %v1922_v13 = vpop.f32.mrb[15].mxu1  ;;  %v1088_v14 = vmax.f32 %v1014_v11, %v1084_v1  ;;  %v1957_v15 = vpop.f32.mrb[21].mxu0 }
 0x1fb   : > { %v1155_v16 = vpop.f32.mrb[16].mxu1 }
 0x1fc   : > { %v1156_v17 = vadd.f32 %v1155_v16, %v1088_v14  ;;  %v1936_v18 = vpop.f32.mrb[17].mxu1 }
 0x1fd   : > { %v1510_v19 = vpop.f32.mrb[22].mxu0 }
 0x1fe   : > { %v1159_v20 = vmul.f32 0.5, %v1156_v17  ;;  %v1971_v21 = vpop.f32.mrb[23].mxu0 }
 0x1ff   : > { %v1297_v22 = vpop.f32.mrb[18].mxu1 }
 0x200   : > { %1160 = vst.msk [vmem:[#allocation2 + $0x8] sm:$0xff] %vm946_vm2, %v1159_v20  ;;  %v1301_v23 = vmax.f32 %v1227_v6, %v1297_v22  ;;  %v1950_v24 = vpop.f32.mrb[19].mxu1 }
 0x202   : > { %v1369_v25 = vadd.f32 %v1368_v12, %v1301_v23 }
 0x203   : > { %v1440_v26 = vpop.f32.mrb[20].mxu1 }
 0x204   : > { %v1372_v27 = vmul.f32 0.5, %v1369_v25  ;;  %v1964_v28 = vpop.f32.mrb[21].mxu1  ;;  %v1514_v29 = vmax.f32 %v1440_v26, %v1510_v19 }
 0x206   : > { %1373 = vst.msk [vmem:[#allocation2 + $0x10] sm:$0xff] %vm946_vm2, %v1372_v27 }
 0x207   : > { %v1581_v30 = vpop.f32.mrb[22].mxu1 }
 0x208   : > { %v1582_v31 = vadd.f32 %v1581_v30, %v1514_v29  ;;  %v1978_v32 = vpop.f32.mrb[23].mxu1 }
 0x20a   : > { %v1585_v33 = vmul.f32 0.5, %v1582_v31 }
 0x20c   : > { %1586 = vst.msk [vmem:[#allocation2 + $0x18] sm:$0xff] %vm946_vm2, %v1585_v33 }
 0x20d PF: > { %s1591_s18 = sld [smem:[#allocation3 + %s2122_s24]]  ;;  %v1592_v34 = vld [vmem:[%s2252_s12] sm:$0xff]  ;;  %v1593_v35 = vld [vmem:[%s2252_s12 + $0x8] sm:$0xff]  ;;  %v1594_v36 = vld [vmem:[%s2252_s12 + $0x10] sm:$0xff]  ;;  %vm1605_vm3 = vcmask 64512  }
 0x20e   : > { %v1595_v37 = vld [vmem:[%s2252_s12 + $0x18] sm:$0xff]  ;;  %v1587_v38 = vld [vmem:[#allocation2] sm:$0xff]  ;;  %v1588_v40 = vld [vmem:[#allocation2 + $0x8] sm:$0xff] }
 0x20f   : > { %v1589_v41 = vld [vmem:[#allocation2 + $0x10] sm:$0xff] }
 0x213   : > { %v1596_v39 = vstv %s1591_s18  ;;  %v1590_v42 = vld [vmem:[#allocation2 + $0x18] sm:$0xff] }
 0x214   : > { %v1597_v43 = vmul.f32 %v1596_v39, %v1592_v34  ;;  %v1598_v44 = vmul.f32 %v1596_v39, %v1593_v35  ;;  %v1599_v45 = vmul.f32 %v1596_v39, %v1594_v36  ;;  %v1600_v46 = vmul.f32 %v1596_v39, %v1595_v37 }
 0x216   : > { %v1601_v47 = vadd.f32 %v1597_v43, %v1587_v38  ;;  %v1602_v48 = vadd.f32 %v1598_v44, %v1588_v40  ;;  %v1603_v49 = vadd.f32 %v1599_v45, %v1589_v41  ;;  %v1604_v50 = vadd.f32 %v1600_v46, %v1590_v42 }
 0x218   : > { %1606 = vst.msk [vmem:[%s2257_s14] sm:$0xff] %vm1605_vm3, %v1601_v47  ;;  %1607 = vst.msk [vmem:[%s2257_s14 + $0x8] sm:$0xff] %vm1605_vm3, %v1602_v48 }
 0x219   : > { %1608 = vst.msk [vmem:[%s2257_s14 + $0x10] sm:$0xff] %vm1605_vm3, %v1603_v49  ;;  %1609 = vst.msk [vmem:[%s2257_s14 + $0x18] sm:$0xff] %vm1605_vm3, %v1604_v50 }
 0x21a PF: > { %s18_s28 = sadd.s32 1, %s2138_s28   ;;  %s2420_s24 = smov %s2130_s26 }
 0x21b   : > { %p15_p5 = scmp.ge.s32.totalorder %s18_s28, 10   ;;  %s2421_s25 = smov %s2134_s27 }
 0x21c   : > { %s2422_s26 = smov %s2425_s30  ;;  %s2423_s27 = smov %s2429_s8 }
 0x21d   :  { %17 = sbr.rel (!%p15_p5) target bundleno = 3 (0x3), region = 92 }
 0x224   :  { %1640 = vsyncpa [#allocation4], 1 }
 0x225   :  { %1642 = vsyncpa [#allocation4 + $0x1], 1 }

</bundles_post_ra>
